<compile_context>
chip_gen: v6e
topology: v6e:2x2x1
jax: 0.10.0
libtpu: 0.0.40
codegen_flags: <defaults>
</compile_context>

<pallas_src>
import math
import functools

import jax
import jax.numpy as jnp
from jax.experimental import pallas as pl
from jax.experimental.pallas import tpu as pltpu

_TARGET_BLOCK_BYTES = 1 << 20  # ~1 MiB per input block: deep pipeline, small VMEM


def make_positional_encoding(d_model: int, sequence_length: int) -> jnp.ndarray:
    """Builds the (sequence_length, d_model) sinusoidal PE buffer (fp32)."""
    position = jnp.arange(sequence_length, dtype=jnp.float32)[:, None]          # (S, 1)
    div_term = jnp.exp(
        jnp.arange(0, d_model, 2, dtype=jnp.float32) * (-math.log(10000.0) / d_model)
    )                                                                            # (D/2,)
    angles = position * div_term                                                 # (S, D/2)
    pe = jnp.zeros((sequence_length, d_model), dtype=jnp.float32)
    pe = pe.at[:, 0::2].set(jnp.sin(angles))
    pe = pe.at[:, 1::2].set(jnp.cos(angles))
    return pe


def _add_pe_kernel(x_ref, pe_ref, o_ref):
    # x_ref/o_ref: (TS, D'); pe_ref: (TS, D')
    o_ref[...] = x_ref[...] + pe_ref[...]


def _add_pe_dropout_kernel(x_ref, pe_ref, m_ref, o_ref):
    # Inverted dropout folded into a single multiply by the pre-scaled mask.
    o_ref[...] = (x_ref[...] + pe_ref[...]) * m_ref[...]


def _pick_tile_rows(s_rows: int, row_bytes: int) -> int:
    """Largest row-tile <= ~1 MiB, multiple of 8 (or the full extent)."""
    target = max(1, _TARGET_BLOCK_BYTES // row_bytes)
    if target >= s_rows:
        return s_rows
    return max(8, (target // 8) * 8)


@functools.partial(jax.jit, static_argnames=("dropout_p", "training"))
def positional_encoding_forward(x, pe, key=None, *, dropout_p: float = 0.1,
                                training: bool = False):
    """x: (B, S, D); pe: (S_max, D) with S_max >= S; key: PRNG key (training only)."""
    B, S, D = x.shape
    pe_slice = pe[:S, :].astype(x.dtype)   # pre-cast: fewer DMA bytes, no in-kernel cast

    # Fold R consecutive sequence rows into the lane axis so the last dim is a
    # multiple of 128 (lane-dense loads/stores).  Fall back to R=1 if S % R != 0.
    R = 128 // math.gcd(D, 128)
    if R > 1 and S % R != 0:
        R = 1
    S_p, D_p = S // R, R * D

    x_r = x.reshape(B, S_p, D_p)
    pe_r = pe_slice.reshape(S_p, D_p)

    TS = _pick_tile_rows(S_p, D_p * x.dtype.itemsize)
    grid = (B, pl.cdiv(S_p, TS))

    x_spec = pl.BlockSpec((None, TS, D_p), lambda b, s: (b, s, 0))
    pe_spec = pl.BlockSpec((TS, D_p), lambda b, s: (s, 0))
    out_spec = pl.BlockSpec((None, TS, D_p), lambda b, s: (b, s, 0))

    compiler_params = pltpu.CompilerParams(
        dimension_semantics=("parallel", "parallel"),   # lets v7x split over 2 TCs
        vmem_limit_bytes=32 * 1024 * 1024,              # explicit, safe on all gens
    )

    if training and dropout_p > 0.0:
        if key is None:
            raise ValueError("training-mode dropout requires a PRNG key")
        keep = jax.random.bernoulli(key, 1.0 - dropout_p, (B, S_p, D_p))
        mask = keep.astype(x.dtype) * jnp.asarray(1.0 / (1.0 - dropout_p), x.dtype)
        m_spec = pl.BlockSpec((None, TS, D_p), lambda b, s: (b, s, 0))
        out_r = pl.pallas_call(
            _add_pe_dropout_kernel,
            out_shape=jax.ShapeDtypeStruct((B, S_p, D_p), x.dtype),
            grid=grid,
            in_specs=[x_spec, pe_spec, m_spec],
            out_specs=out_spec,
            compiler_params=compiler_params,
        )(x_r, pe_r, mask)
    else:
        out_r = pl.pallas_call(
            _add_pe_kernel,
            out_shape=jax.ShapeDtypeStruct((B, S_p, D_p), x.dtype),
            grid=grid,
            in_specs=[x_spec, pe_spec],
            out_specs=out_spec,
            compiler_params=compiler_params,
        )(x_r, pe_r)

    return out_r.reshape(B, S, D)


if __name__ == "__main__":
    # Small shapes consistent with the module: batch=2, seq=8, d_model=32.
    B, S, D = 2, 8, 32
    SEQ_MAX = 64  # stands in for the module's sequence_length buffer size

    root = jax.random.PRNGKey(0)
    kx, kdrop = jax.random.split(root)
    x = jax.random.normal(kx, (B, S, D), dtype=jnp.float32)
    pe = make_positional_encoding(D, SEQ_MAX)

    ref = x + pe[None, :S, :]

    # Eval mode (dropout = identity): deterministic, check against reference.
    out_eval = jax.block_until_ready(
        positional_encoding_forward(x, pe, dropout_p=0.1, training=False))
    assert out_eval.shape == (B, S, D)
    assert jnp.allclose(out_eval, ref, atol=1e-6), "eval-mode mismatch"

    # Training mode: every element is either 0 (dropped) or (x+pe)/(1-p) (kept).
    p = 0.1
    out_train = jax.block_until_ready(
        positional_encoding_forward(x, pe, kdrop, dropout_p=p, training=True))
    assert out_train.shape == (B, S, D)
    dropped = jnp.isclose(out_train, 0.0, atol=1e-6)
    kept_ok = jnp.isclose(out_train, ref / (1.0 - p), atol=1e-5, rtol=1e-5)
    assert bool(jnp.all(dropped | kept_ok)), "train-mode dropout scaling mismatch"

    print("KERNEL_OK")
</pallas_src>

<mosaic_0001>
module attributes {stable_mosaic.version = 11 : i64} {
  func.func @_add_pe_kernel(%arg0: i32, %arg1: i32, %arg2: memref<1x2x128xf32, #tpu.memory_space<vmem>>, %arg3: memref<2x128xf32, #tpu.memory_space<vmem>>, %arg4: memref<1x2x128xf32, #tpu.memory_space<vmem>>) attributes {dimension_semantics = [#tpu.dimension_semantics<parallel>, #tpu.dimension_semantics<parallel>], iteration_bounds = array<i64: 2, 1>, scalar_prefetch = 0 : i64, scratch_operands = 0 : i64, tpu.core_type = #tpu.core_type<tc>, window_params = [{transform_indices = @transform_0, window_bounds = array<i64: 1, 2, 128>}, {transform_indices = @transform_1, window_bounds = array<i64: 2, 128>}, {transform_indices = @transform_2, window_bounds = array<i64: 1, 2, 128>}]} {
    %c0 = arith.constant 0 : index
    %c0_0 = arith.constant 0 : index
    %c0_1 = arith.constant 0 : index
    %0 = vector.load %arg2[%c0, %c0_0, %c0_1] : memref<1x2x128xf32, #tpu.memory_space<vmem>>, vector<1x2x128xf32>
    %1 = vector.shape_cast %0 : vector<1x2x128xf32> to vector<2x128xf32>
    %c0_2 = arith.constant 0 : index
    %c0_3 = arith.constant 0 : index
    %2 = vector.load %arg3[%c0_2, %c0_3] : memref<2x128xf32, #tpu.memory_space<vmem>>, vector<2x128xf32>
    %3 = arith.addf %1, %2 : vector<2x128xf32>
    %c0_4 = arith.constant 0 : index
    %c0_5 = arith.constant 0 : index
    %c0_6 = arith.constant 0 : index
    %4 = vector.load %arg4[%c0_4, %c0_5, %c0_6] : memref<1x2x128xf32, #tpu.memory_space<vmem>>, vector<1x2x128xf32>
    %5 = vector.shape_cast %4 : vector<1x2x128xf32> to vector<2x128xf32>
    %6 = vector.shape_cast %3 : vector<2x128xf32> to vector<1x2x128xf32>
    tpu.vector_store %arg4[%c0_4, %c0_5, %c0_6], %6 {strides = array<i32>} : memref<1x2x128xf32, #tpu.memory_space<vmem>>, vector<1x2x128xf32>,
    return
  }
  func.func @transform_0(%arg0: i32, %arg1: i32) -> (i32, i32, i32) {
    %c0_i32 = arith.constant 0 : i32
    %c0_i32_0 = arith.constant 0 : i32
    return %arg0, %arg1, %c0_i32 : i32, i32, i32
  }
  func.func @transform_1(%arg0: i32, %arg1: i32) -> (i32, i32) {
    %c0_i32 = arith.constant 0 : i32
    %c0_i32_0 = arith.constant 0 : i32
    return %arg1, %c0_i32 : i32, i32
  }
  func.func @transform_2(%arg0: i32, %arg1: i32) -> (i32, i32, i32) {
    %c0_i32 = arith.constant 0 : i32
    %c0_i32_0 = arith.constant 0 : i32
    return %arg0, %arg1, %c0_i32 : i32, i32, i32
  }
}

</mosaic_0001>

<bundles_post_ra>
// kernel: positional_encoding_forward.1
= control target key start
LH: loop header
LB: loop body
LE: loop exit
PB: predicated region body
PF: predicated region fallthrough
CT: control target
= control target key end

     0   :  { %s354_s9 = smov 0   ;;  %s331_s10 = smov 0   ;;  %s368_s0 = inlined_call_operand.vmem [shape: f32[2,2,128], index: 0, kind: input, shape index: {}]   ;;  %s369_s1 = inlined_call_operand.vmem [shape: f32[2,128], index: 1, kind: input, shape index: {}]   ;;  %s370_s2 = inlined_call_operand.vmem [shape: f32[2,2,128], index: 2, kind: output, shape index: {}]  }
   0x1   :  { %s335_s11 = smov 0  }
   0x2 LB: > { %s24_s12 = sadd.s32 1, %s333_s10  ;;  %p286_p0 = scmp.ge.s32.totalorder %s337_s11, 1  ;;  %s337_s11 = sphi %s335_s11, %s12_s11   ;;  %s333_s10 = sphi %s331_s10, %s332_s10   ;;  %s329_s9 = sphi %s354_s9, %s371_s9  }
   0x3   : > { %p26_p1 = scmp.ge.s32.totalorder %s24_s12, 2  ;;  %p139_p2 = scmp.lt.s32.totalorder %s337_s11, 3 }
   0x5   : > { %s373_s12 = smov (%p26_p1, %s24_s12), 0  ;;  %p140_p3 = pnand %p286_p0, %p139_p2 }
   0x6   : > { %p169_p4 = scmp.lt.s32.totalorder (!%p140_p3), %s329_s9, 1 }
   0x7   : > { %143 = sbr.rel (%p140_p3) target bundleno = 19 (0x13), region = 28 }
   0xc   : > { %s375_s9 = smov (!%p169_p4, %s329_s9), 1  ;;  %v188_v0 = vld [vmem:[%s369_s1] sm:$0x3] }
   0xd   : > { %s287_s13 = sshll.u32 %s375_s9, 1 }
   0xe   : > { %s175_s18 = scalar_lea.vmem %s368_s0, %s287_s13  ;;  %s186_s21 = scalar_lea.vmem %s370_s2, %s287_s13 }
   0xf   : > { %v187_v1 = vld [vmem:[%s175_s18] sm:$0x3] }
  0x10   : > { %v189_v2 = vadd.f32 %v188_v0, %v187_v1 }
  0x12   : > { %190 = vst [vmem:[%s186_s21] sm:$0x3] %v189_v2 }
  0x13 PF: > { %s12_s11 = sadd.s32 1, %s337_s11   ;;  %s371_s9 = smov %s333_s10 }
  0x14   : > { %p9_p5 = scmp.ge.s32.totalorder %s12_s11, 4   ;;  %s332_s10 = smov %s373_s12  }
  0x16   :  { %11 = sbr.rel (!%p9_p5) target bundleno = 2 (0x2), region = 61 }

</bundles_post_ra>
